<compile_context>
chip_gen: v7x
topology: tpu7x:2x2x1
jax: 0.10.0
libtpu: 0.0.40
codegen_flags: <defaults>
</compile_context>

<pallas_src>
import functools

import jax
import jax.numpy as jnp
from jax import lax
from jax.experimental import pallas as pl
from jax.experimental.pallas import tpu as pltpu


N_SQ, N_SIDE, N_CS, N_EP = 13, 2, 4, 9
N_ALL = N_SQ + N_SIDE + N_CS + N_EP          # 28 fused head rows
M_COLS = 72                                  # 64 bilinear cols + 1 pool col + 7 pad


# --------------------------------------------------------------------------
# Pallas kernel: one grid step per bt batch elements.
# --------------------------------------------------------------------------
def board_head_kernel(x_ref, w_ref, m_ref, b_ref, out_ref):
    # x_ref  : (bt, C, HW)   native x dtype (f32 or bf16)
    # w_ref  : (28, C)       compute dtype   (fused head weights, transposed)
    # m_ref  : (HW, 72)      f32             (bilinear columns + pool column)
    # b_ref  : (28, 72)      f32             (fused, post-resize biases)
    # out_ref: (bt, 28, 72)  f32
    bt = x_ref.shape[0]

    def body(b, carry):
        # in-kernel cast (no-op when dtypes match); hidden under the x DMA
        xb = x_ref[b].astype(w_ref.dtype)                               # (C, HW)
        # fused head projection, lane-dense output: (28, C) @ (C, HW) -> (28, HW)
        y = jnp.dot(w_ref[...], xb, preferred_element_type=jnp.float32)
        # bilinear resize + global-avg-pool folded into one matmul:
        # (28, HW) @ (HW, 72) -> (28, 72); biases added after (rows sum to 1)
        out_ref[b] = (jnp.dot(y, m_ref[...], preferred_element_type=jnp.float32)
                      + b_ref[...])
        return carry

    lax.fori_loop(0, bt, body, None, unroll=True)


# --------------------------------------------------------------------------
# Glue: PyTorch-exact bilinear (align_corners=False) interpolation matrix.
# --------------------------------------------------------------------------
def _interp_matrix_1d(in_size: int, out_size: int) -> jnp.ndarray:
    scale = in_size / out_size
    dst = jnp.arange(out_size, dtype=jnp.float32)
    src = scale * (dst + 0.5) - 0.5
    src = jnp.maximum(src, 0.0)                       # PyTorch clamps negative src
    i0 = jnp.minimum(jnp.floor(src).astype(jnp.int32), in_size - 1)
    i1 = jnp.minimum(i0 + 1, in_size - 1)
    l1 = src - i0.astype(jnp.float32)
    l0 = 1.0 - l1
    m = jnp.zeros((out_size, in_size), jnp.float32)
    m = m.at[jnp.arange(out_size), i0].add(l0)
    m = m.at[jnp.arange(out_size), i1].add(l1)
    return m


def _choose_block_batch(B: int, C: int, HW: int, itemsize: int, bt_request: int) -> int:
    # VMEM budget for the double-buffered x block (the only big DMA).
    budget = 24 * 1024 * 1024
    cap = max(1, budget // (2 * C * HW * itemsize))
    target = max(1, min(bt_request, B, cap))
    # >=4 grid steps when B allows (2 per v7x TensorCore); >=2 otherwise.
    if B >= 4:
        target = min(target, max(1, B // 4))
    elif B >= 2:
        target = min(target, B // 2)
    # Largest divisor of B not exceeding target -> no batch padding / extra copy.
    bt = 1
    for d in range(1, target + 1):
        if B % d == 0:
            bt = d
    return bt


# --------------------------------------------------------------------------
# Wrapper
# --------------------------------------------------------------------------
@functools.partial(jax.jit, static_argnames=("compute_dtype", "bt_request"))
def board_head_forward(x_nchw, params, compute_dtype=jnp.bfloat16, bt_request=16):
    B, C, H, W = x_nchw.shape
    HW = H * W

    # native layout: NCHW -> (B, C, H*W) is a free contiguous reshape (no copy,
    # no cast — any bf16 conversion happens inside the kernel).
    x_flat = x_nchw.reshape(B, C, HW)

    # fused resize + pool matrix, transposed: (HW, 72), f32
    mh = _interp_matrix_1d(H, 8)
    mw = _interp_matrix_1d(W, 8)
    m_sq = jnp.kron(mh, mw)                                       # (64, HW)
    m_aug_t = jnp.concatenate(
        [m_sq.T,                                                  # bilinear cols
         jnp.full((HW, 1), 1.0 / HW, jnp.float32),                # avg-pool col
         jnp.zeros((HW, M_COLS - 65), jnp.float32)], axis=1)      # (HW, 72)

    # fused head weights, transposed (28, C); post-resize bias map (28, 72)
    w_all_t = jnp.concatenate(
        [params["sq_w"].reshape(N_SQ, C),
         params["side_w"],
         params["castle_w"],
         params["ep_w"]], axis=0).astype(compute_dtype)           # (28, C)

    bias_t = jnp.zeros((N_ALL, M_COLS), jnp.float32)
    bias_t = bias_t.at[:N_SQ, :64].set(params["sq_b"][:, None])
    bias_t = bias_t.at[N_SQ:N_SQ + N_SIDE, 64].set(params["side_b"])
    bias_t = bias_t.at[N_SQ + N_SIDE:N_SQ + N_SIDE + N_CS, 64].set(params["castle_b"])
    bias_t = bias_t.at[N_SQ + N_SIDE + N_CS:, 64].set(params["ep_b"])

    # batch tiling (bt divides B -> no pad copy of x)
    x_item = jnp.dtype(x_flat.dtype).itemsize
    bt = _choose_block_batch(B, C, HW, x_item, bt_request)
    grid_b = B // bt

    # explicit VMEM limit: x/out double buffers + resident small blocks + slack
    w_item = jnp.dtype(compute_dtype).itemsize
    vmem_need = (2 * bt * C * HW * x_item
                 + 2 * bt * N_ALL * M_COLS * 4
                 + 2 * (HW * M_COLS * 4 + N_ALL * C * w_item + N_ALL * M_COLS * 4))
    vmem_limit = int(min(max(vmem_need + (4 << 20), 16 << 20), 48 << 20))

    bcast = lambda g: (0, 0)                                      # resident blocks

    grid_spec = pltpu.PrefetchScalarGridSpec(
        num_scalar_prefetch=0,
        grid=(grid_b,),
        in_specs=[
            pl.BlockSpec((bt, C, HW), lambda g: (g, 0, 0)),       # x (only big DMA)
            pl.BlockSpec((N_ALL, C), bcast),                      # W_all^T
            pl.BlockSpec((HW, M_COLS), bcast),                    # m_aug^T
            pl.BlockSpec((N_ALL, M_COLS), bcast),                 # bias^T
        ],
        out_specs=pl.BlockSpec((bt, N_ALL, M_COLS), lambda g: (g, 0, 0)),
    )

    out = pl.pallas_call(
        board_head_kernel,
        out_shape=jax.ShapeDtypeStruct((B, N_ALL, M_COLS), jnp.float32),
        grid_spec=grid_spec,
        compiler_params=pltpu.CompilerParams(
            dimension_semantics=("parallel",),
            vmem_limit_bytes=vmem_limit),
    )(x_flat, w_all_t, m_aug_t, bias_t)

    # glue: slice the fused (B, 28, 72) result back into the four heads
    sq = jnp.transpose(out[:, :N_SQ, :64], (0, 2, 1)).reshape(B, 8, 8, N_SQ)
    side = out[:, N_SQ:N_SQ + N_SIDE, 64]
    castle = out[:, N_SQ + N_SIDE:N_SQ + N_SIDE + N_CS, 64]
    ep = out[:, N_SQ + N_SIDE + N_CS:, 64]
    return sq, side, castle, ep


# --------------------------------------------------------------------------
# Pure-JAX reference (same math, no Pallas) for a correctness check.
# --------------------------------------------------------------------------
def board_head_reference(x_nchw, params):
    B, C, H, W = x_nchw.shape
    conv = jnp.einsum('bchw,oc->bohw', x_nchw,
                      params["sq_w"].reshape(13, C)) + params["sq_b"][None, :, None, None]
    mh = _interp_matrix_1d(H, 8)
    mw = _interp_matrix_1d(W, 8)
    sq = jnp.einsum('ph,qw,bohw->bpqo', mh, mw, conv)             # (B,8,8,13)
    pooled = jnp.mean(x_nchw, axis=(2, 3))                        # (B,C)
    side = pooled @ params["side_w"].T + params["side_b"]
    castle = pooled @ params["castle_w"].T + params["castle_b"]
    ep = pooled @ params["ep_w"].T + params["ep_b"]
    return sq, side, castle, ep


# --------------------------------------------------------------------------
def make_params(key, in_channels):
    ks = jax.random.split(key, 8)
    s = 0.02
    return {
        "sq_w":     s * jax.random.normal(ks[0], (13, in_channels, 1, 1), jnp.float32),
        "sq_b":     s * jax.random.normal(ks[1], (13,), jnp.float32),
        "side_w":   s * jax.random.normal(ks[2], (2, in_channels), jnp.float32),
        "side_b":   s * jax.random.normal(ks[3], (2,), jnp.float32),
        "castle_w": s * jax.random.normal(ks[4], (4, in_channels), jnp.float32),
        "castle_b": s * jax.random.normal(ks[5], (4,), jnp.float32),
        "ep_w":     s * jax.random.normal(ks[6], (9, in_channels), jnp.float32),
        "ep_b":     s * jax.random.normal(ks[7], (9,), jnp.float32),
    }


if __name__ == "__main__":
    B, C, H, W = 2, 32, 16, 16          # small shapes (in_channels=32 instead of 960)
    key = jax.random.PRNGKey(0)
    kx, kp = jax.random.split(key)
    x = jax.random.normal(kx, (B, C, H, W), jnp.float32)
    params = make_params(kp, C)

    refs = board_head_reference(x, params)
    names = ["sq", "side", "castle", "ep"]

    # f32 path: tight check of the fused-kernel structure.
    outs_f32 = jax.block_until_ready(
        board_head_forward(x, params, compute_dtype=jnp.float32))
    for name, o, r in zip(names, outs_f32, refs):
        assert o.shape == r.shape, (name, o.shape, r.shape)
        assert jnp.allclose(o, r, atol=1e-4, rtol=1e-3), name

    # default bf16 compute path: looser tolerance (bf16 rounding of x/W only;
    # all matmuls accumulate in f32).
    outs = jax.block_until_ready(board_head_forward(x, params))
    for name, o, r in zip(names, outs, refs):
        assert o.shape == r.shape, (name, o.shape, r.shape)
        assert jnp.allclose(o, r, atol=5e-3, rtol=2e-2), name

    assert outs[0].shape == (B, 8, 8, 13)
    assert outs[1].shape == (B, 2)
    assert outs[2].shape == (B, 4)
    assert outs[3].shape == (B, 9)
    print("KERNEL_OK")
</pallas_src>

<mosaic_0001>
module attributes {stable_mosaic.version = 11 : i64} {
  func.func @board_head_kernel(%arg0: i32, %arg1: memref<1x32x256xf32, #tpu.memory_space<vmem>>, %arg2: memref<28x32xf32, #tpu.memory_space<vmem>>, %arg3: memref<256x72xf32, #tpu.memory_space<vmem>>, %arg4: memref<28x72xf32, #tpu.memory_space<vmem>>, %arg5: memref<1x28x72xf32, #tpu.memory_space<vmem>>) attributes {dimension_semantics = [#tpu.dimension_semantics<parallel>], iteration_bounds = array<i64: 2>, scalar_prefetch = 0 : i64, scratch_operands = 0 : i64, tpu.core_type = #tpu.core_type<tc>, window_params = [{transform_indices = @transform_0, window_bounds = array<i64: 1, 32, 256>}, {pipeline_mode = #tpu.pipeline_mode<synchronous>, transform_indices = @transform_1, window_bounds = array<i64: 28, 32>}, {pipeline_mode = #tpu.pipeline_mode<synchronous>, transform_indices = @transform_2, window_bounds = array<i64: 256, 72>}, {pipeline_mode = #tpu.pipeline_mode<synchronous>, transform_indices = @transform_3, window_bounds = array<i64: 28, 72>}, {transform_indices = @transform_4, window_bounds = array<i64: 1, 28, 72>}]} {
    %c0_i32 = arith.constant 0 : i32
    %0 = arith.index_cast %c0_i32 : i32 to index
    %c0 = arith.constant 0 : index
    %c0_0 = arith.constant 0 : index
    %1 = vector.load %arg1[%0, %c0, %c0_0] : memref<1x32x256xf32, #tpu.memory_space<vmem>>, vector<1x32x256xf32>
    %2 = vector.shape_cast %1 : vector<1x32x256xf32> to vector<32x256xf32>
    %c0_1 = arith.constant 0 : index
    %c0_2 = arith.constant 0 : index
    %3 = vector.load %arg2[%c0_1, %c0_2] : memref<28x32xf32, #tpu.memory_space<vmem>>, vector<28x32xf32>
    %cst = arith.constant dense<0.000000e+00> : vector<28x256xf32>
    %4 = tpu.matmul %3, %2, %cst {dimension_numbers = #tpu.dot_dimension_numbers<[1], [0], [0], [1], [0, 0, 1, 1], [], []>} : vector<28x32xf32>, vector<32x256xf32>, vector<28x256xf32> -> vector<28x256xf32>
    %c0_3 = arith.constant 0 : index
    %c0_4 = arith.constant 0 : index
    %5 = vector.load %arg3[%c0_3, %c0_4] : memref<256x72xf32, #tpu.memory_space<vmem>>, vector<256x72xf32>
    %cst_5 = arith.constant dense<0.000000e+00> : vector<28x72xf32>
    %6 = tpu.matmul %4, %5, %cst_5 {dimension_numbers = #tpu.dot_dimension_numbers<[1], [0], [0], [1], [0, 0, 1, 1], [], []>} : vector<28x256xf32>, vector<256x72xf32>, vector<28x72xf32> -> vector<28x72xf32>
    %c0_6 = arith.constant 0 : index
    %c0_7 = arith.constant 0 : index
    %7 = vector.load %arg4[%c0_6, %c0_7] : memref<28x72xf32, #tpu.memory_space<vmem>>, vector<28x72xf32>
    %8 = arith.addf %6, %7 : vector<28x72xf32>
    %9 = arith.index_cast %c0_i32 : i32 to index
    %c0_8 = arith.constant 0 : index
    %c0_9 = arith.constant 0 : index
    %10 = vector.load %arg5[%9, %c0_8, %c0_9] : memref<1x28x72xf32, #tpu.memory_space<vmem>>, vector<1x28x72xf32>
    %11 = vector.shape_cast %10 : vector<1x28x72xf32> to vector<28x72xf32>
    %12 = vector.shape_cast %8 : vector<28x72xf32> to vector<1x28x72xf32>
    tpu.vector_store %arg5[%9, %c0_8, %c0_9], %12 {strides = array<i32>} : memref<1x28x72xf32, #tpu.memory_space<vmem>>, vector<1x28x72xf32>,
    %c1_i32 = arith.constant 1 : i32
    return
  }
  func.func @transform_0(%arg0: i32) -> (i32, i32, i32) {
    %c0_i32 = arith.constant 0 : i32
    %c0_i32_0 = arith.constant 0 : i32
    %c0_i32_1 = arith.constant 0 : i32
    return %arg0, %c0_i32, %c0_i32_0 : i32, i32, i32
  }
  func.func @transform_1(%arg0: i32) -> (i32, i32) {
    %c0_i32 = arith.constant 0 : i32
    %c0_i32_0 = arith.constant 0 : i32
    %c0_i32_1 = arith.constant 0 : i32
    return %c0_i32, %c0_i32_0 : i32, i32
  }
  func.func @transform_2(%arg0: i32) -> (i32, i32) {
    %c0_i32 = arith.constant 0 : i32
    %c0_i32_0 = arith.constant 0 : i32
    %c0_i32_1 = arith.constant 0 : i32
    return %c0_i32, %c0_i32_0 : i32, i32
  }
  func.func @transform_3(%arg0: i32) -> (i32, i32) {
    %c0_i32 = arith.constant 0 : i32
    %c0_i32_0 = arith.constant 0 : i32
    %c0_i32_1 = arith.constant 0 : i32
    return %c0_i32, %c0_i32_0 : i32, i32
  }
  func.func @transform_4(%arg0: i32) -> (i32, i32, i32) {
    %c0_i32 = arith.constant 0 : i32
    %c0_i32_0 = arith.constant 0 : i32
    %c0_i32_1 = arith.constant 0 : i32
    return %arg0, %c0_i32, %c0_i32_0 : i32, i32, i32
  }
}

</mosaic_0001>

<bundles_post_ra>
// kernel: board_head_forward.1
= control target key start
LH: loop header
LB: loop body
LE: loop exit
PB: predicated region body
PF: predicated region fallthrough
CT: control target
= control target key end

     0   :  { %s654_s15 = smov 0   ;;  %s806_s0 = inlined_call_operand.vmem [shape: f32[2,32,256], index: 0, kind: input, shape index: {}]   ;;  %s807_s1 = inlined_call_operand.vmem [shape: f32[28,32], index: 1, kind: input, shape index: {}]   ;;  %s808_s2 = inlined_call_operand.vmem [shape: f32[256,72], index: 2, kind: input, shape index: {}]   ;;  %s809_s3 = inlined_call_operand.vmem [shape: f32[28,72], index: 3, kind: input, shape index: {}]   ;;  %s810_s4 = inlined_call_operand.vmem [shape: f32[2,28,72], index: 4, kind: output, shape index: {}]  }
   0x1 LB: > { %s494_s16 = sadd.s32 4294967295, %s626_s15   ;;  %p498_p0 = scmp.ge.s32.totalorder %s626_s15, 1  ;;  %s626_s15 = sphi %s654_s15, %s14_s15  }
   0x2   : > { %p162_p1 = scmp.lt.s32.totalorder %s626_s15, 3 }
   0x4   : > { %p163_p2 = pnand %p498_p0, %p162_p1 }
   0x5   : > { %p188_p3 = scmp.lt.s32.totalorder (!%p163_p2), %s494_s16, 1  ;;  %v628_v0 = vmov (!%p163_p2), 0.0   ;;  %v328_v1 = vld [vmem:[%s808_s2 + $0x80] sm:$0xff] (!%p163_p2)  ;;  %v329_v2 = vld [vmem:[%s808_s2 + $0x88] sm:$0xff] (!%p163_p2)  ;;  %v330_v6 = vld [vmem:[%s808_s2 + $0x90] sm:$0xff] (!%p163_p2)  ;;  %vm210_vm0 = vcmask (!%p163_p2), 261120  }
   0x6   : > { %166 = sbr.rel (%p163_p2) target bundleno = 471 (0x1d7), region = 36  ;;  %287 = vmatprep.mubr.f32.mxu0 (!%p163_p2), %v628_v0  ;;  %v563_v3 = vpack.c.bf16 (!%p163_p2), %v329_v2, %v328_v1  ;;  %v312_v4 = vld [vmem:[%s808_s2] sm:$0xff] (!%p163_p2)  ;;  %v313_v5 = vld [vmem:[%s808_s2 + $0x8] sm:$0xff] (!%p163_p2)  ;;  %v331_v8 = vld [vmem:[%s808_s2 + $0x98] sm:$0xff] (!%p163_p2)  ;;  %vm433_vm1 = vcmask (!%p163_p2), 588800   ;;  %vm437_vm2 = vcmask (!%p163_p2), 584704  }
   0x7   : > { %v565_v7 = vpack.c.bf16 (!%p163_p2), %v313_v5, %v312_v4  ;;  %v567_v9 = vpack.c.bf16 (!%p163_p2), %v331_v8, %v330_v6  ;;  %v314_v10 = vld [vmem:[%s808_s2 + $0x10] sm:$0xff] (!%p163_p2)  ;;  %v315_v11 = vld [vmem:[%s808_s2 + $0x18] sm:$0xff] (!%p163_p2)  ;;  %v332_v12 = vld [vmem:[%s808_s2 + $0xa0] sm:$0xff] (!%p163_p2) }
   0x8   : > { %595 = vmatprep.subr.bf16.mxu1 (!%p163_p2), %v563_v3  ;;  %v333_v13 = vld [vmem:[%s808_s2 + $0xa8] sm:$0xff] (!%p163_p2)  ;;  %v316_v17 = vld [vmem:[%s808_s2 + $0x20] sm:$0xff] (!%p163_p2)  ;;  %v569_v22 = vpack.c.bf16 (!%p163_p2), %v315_v11, %v314_v10  ;;  %v334_v29 = vld [vmem:[%s808_s2 + $0xb0] sm:$0xff] (!%p163_p2) }
   0x9   : > { %603 = vmatpush3.bf16.msra.mxu1 (!%p163_p2), %v565_v7  ;;  %v571_v27 = vpack.c.bf16 (!%p163_p2), %v333_v13, %v332_v12  ;;  %v317_v28 = vld [vmem:[%s808_s2 + $0x28] sm:$0xff] (!%p163_p2)  ;;  %v335_v30 = vld [vmem:[%s808_s2 + $0xb8] sm:$0xff] (!%p163_p2)  ;;  %v318_v34 = vld [vmem:[%s808_s2 + $0x30] sm:$0xff] (!%p163_p2) }
   0xa   : > { %596 = vmatprep.subr.bf16.mxu1 (!%p163_p2), %v567_v9  ;;  %v573_v32 = vpack.c.bf16 (!%p163_p2), %v317_v28, %v316_v17  ;;  %v575_v33 = vpack.c.bf16 (!%p163_p2), %v335_v30, %v334_v29  ;;  %v319_v35 = vld [vmem:[%s808_s2 + $0x38] sm:$0xff] (!%p163_p2)  ;;  %v206_v36 = vld [vmem:[%s807_s1] sm:$0xff] (!%p163_p2)  ;;  %v337_v38 = vld [vmem:[%s808_s2 + $0xc8] sm:$0xff] (!%p163_p2) }
   0xb   : > { %v336_v37 = vld [vmem:[%s808_s2 + $0xc0] sm:$0xff] (!%p163_p2)  ;;  %v577_v39 = vpack.c.bf16 (!%p163_p2), %v319_v35, %v318_v34  ;;  %v321_v41 = vld [vmem:[%s808_s2 + $0x48] sm:$0xff] (!%p163_p2)  ;;  %v338_v44 = vld [vmem:[%s808_s2 + $0xd0] sm:$0xff] (!%p163_p2) }
   0xc   : > { %v320_v40 = vld [vmem:[%s808_s2 + $0x40] sm:$0xff] (!%p163_p2)  ;;  %v579_v42 = vpack.c.bf16 (!%p163_p2), %v337_v38, %v336_v37  ;;  %v207_v43 = vld [vmem:[%s807_s1 + $0x8] sm:$0xff] (!%p163_p2)  ;;  %v339_v45 = vld [vmem:[%s808_s2 + $0xd8] sm:$0xff] (!%p163_p2) }
   0xd   : > { %s812_s16 = smov (!%p188_p3, %s494_s16), 1  ;;  %604 = vmatpush3.bf16.msra.mxu1 %v569_v22  ;;  %v581_v46 = vpack.c.bf16 %v321_v41, %v320_v40  ;;  %v322_v47 = vld [vmem:[%s808_s2 + $0x50] sm:$0xff]  ;;  %v323_v48 = vld [vmem:[%s808_s2 + $0x58] sm:$0xff]  ;;  %v583_v49 = vpack.c.bf16 %v339_v45, %v338_v44  ;;  %v340_v51 = vld [vmem:[%s808_s2 + $0xe0] sm:$0xff] }
   0xe   : > { %s509_s29 = sshll.u32 %s812_s16, 6  ;;  %597 = vmatprep.subr.bf16.mxu1 %v571_v27  ;;  %v208_v50 = vld [vmem:[%s807_s1 + $0x10] sm:$0xff]  ;;  %v341_v52 = vld [vmem:[%s808_s2 + $0xe8] sm:$0xff]  ;;  %v585_v53 = vpack.c.bf16 %v323_v48, %v322_v47  ;;  %v324_v54 = vld [vmem:[%s808_s2 + $0x60] sm:$0xff]  ;;  %s510_s21 = sshll.u32 %s812_s16, 5 }
   0xf   : > { %s192_s10 = scalar_lea.vmem %s806_s0, %s509_s29  ;;  %v325_v55 = vld [vmem:[%s808_s2 + $0x68] sm:$0xff]  ;;  %v587_v56 = vpack.c.bf16 %v341_v52, %v340_v51  ;;  %v342_v57 = vld [vmem:[%s808_s2 + $0xf0] sm:$0xff]  ;;  %v343_v58 = vld [vmem:[%s808_s2 + $0xf8] sm:$0xff]  ;;  %s197_s26 = scalar_lea.vmem %s810_s4, %s510_s21 }
  0x10   : > { %v199_v14 = vld [vmem:[%s192_s10 + $0x8] sm:$0xff]  ;;  %v201_v15 = vld [vmem:[%s192_s10 + $0x18] sm:$0xff]  ;;  %v198_v16 = vld [vmem:[%s192_s10] sm:$0xff]  ;;  %v589_v60 = vpack.c.bf16 %v325_v55, %v324_v54  ;;  %v591_v61 = vpack.c.bf16 %v343_v58, %v342_v57 }
  0x11   : > { %v555_v18 = vpack.c.bf16 %v201_v15, %v199_v14  ;;  %v200_v19 = vld [vmem:[%s192_s10 + $0x10] sm:$0xff]  ;;  %v203_v20 = vld [vmem:[%s192_s10 + $0x28] sm:$0xff]  ;;  %v205_v21 = vld [vmem:[%s192_s10 + $0x38] sm:$0xff]  ;;  %605 = vmatpush3.bf16.msra.mxu1 %v573_v32 }
  0x12   : > { %v557_v23 = vpack.c.bf16 %v200_v19, %v198_v16  ;;  %v559_v24 = vpack.c.bf16 %v205_v21, %v203_v20  ;;  %v202_v25 = vld [vmem:[%s192_s10 + $0x20] sm:$0xff]  ;;  %v204_v26 = vld [vmem:[%s192_s10 + $0x30] sm:$0xff]  ;;  %598 = vmatprep.subr.bf16.mxu1 %v575_v33  ;;  %v209_v59 = vld [vmem:[%s807_s1 + $0x18] sm:$0xf] }
  0x13   : > { %556 = vmatprep.subr.bf16.mxu0 %v555_v18  ;;  %v561_v31 = vpack.c.bf16 %v204_v26, %v202_v25  ;;  %v326_v62 = vld [vmem:[%s808_s2 + $0x70] sm:$0xff]  ;;  %v327_v63 = vld [vmem:[%s808_s2 + $0x78] sm:$0xff]  ;;  %v344_v10 = vld [vmem:[%s809_s3] sm:$0xff] }
  0x14   : > { %558 = vmatpush1.bf16.msra.mxu0 %v557_v23  ;;  %v345_v15 = vld [vmem:[%s809_s3 + $0x8] sm:$0xff]  ;;  %v346_v20 = vld [vmem:[%s809_s3 + $0x10] sm:$0xff]  ;;  %v347_v25 = vld [vmem:[%s809_s3 + $0x18] sm:$0xf] }
  0x15   : > { %560 = vmatprep.subr.bf16.mxu0 %v559_v24  ;;  %606 = vmatpush3.bf16.msra.mxu1 %v577_v39 }
  0x16   : > { %599 = vmatprep.subr.bf16.mxu1 %v579_v42 }
  0x18   : > { %562 = vmatpush1.bf16.msra.mxu0 %v561_v31 }
  0x19   : > { %564 = vmatprep.subr.bf16.mxu0 %v563_v3  ;;  %607 = vmatpush3.bf16.msra.mxu1 %v581_v46 }
  0x1a   : > { %600 = vmatprep.subr.bf16.mxu1 %v583_v49 }
  0x1b   : > { %503 = vmatmul.mubr.msk.f32.vlgmr.msra.gmra.mrb[0].mxu0 %vm210_vm0, %v206_v36 }
  0x1c   : > { %293 = vmatprep.mubr.f32.mxu0 %v628_v0  ;;  %566 = vmatpush3.bf16.msra.mxu0 %v565_v7 }
  0x1d   : > { %568 = vmatprep.subr.bf16.mxu0 %v567_v9  ;;  %608 = vmatpush3.bf16.msra.mxu1 %v585_v53 }
  0x1e   : > { %601 = vmatprep.subr.bf16.mxu1 %v587_v56 }
  0x1f   : > { %504 = vmatmul.mubr.msk.f32.gmra.mrb[2].mxu0 %vm210_vm0, %v207_v43 }
  0x20   : > { %299 = vmatprep.mubr.f32.mxu0 %v628_v0  ;;  %570 = vmatpush3.bf16.msra.mxu0 %v569_v22 }
  0x21   : > { %572 = vmatprep.subr.bf16.mxu0 %v571_v27  ;;  %609 = vmatpush3.bf16.msra.mxu1 %v589_v60 }
  0x22   : > { %602 = vmatprep.subr.bf16.mxu1 %v591_v61 }
  0x23   : > { %505 = vmatmul.mubr.msk.f32.gmra.mrb[4].mxu0 %vm210_vm0, %v208_v50 }
  0x24   : > { %305 = vmatprep.mubr.f32.mxu0 %v628_v0  ;;  %574 = vmatpush3.bf16.msra.mxu0 %v573_v32  ;;  %v593_v0 = vpack.c.bf16 %v327_v63, %v326_v62 }
  0x25   : > { %576 = vmatprep.subr.bf16.mxu0 %v575_v33 }
  0x26   : > { %610 = vmatpush3.bf16.msra.mxu1 %v593_v0 }
  0x27   : > { %506 = vmatmul.mubr.msk.f32.gmra.mrb[6].mxu0 %vm210_vm0, %v209_v59 }
  0x28   : > { %578 = vmatpush3.bf16.msra.mxu0 %v577_v39 }
  0x29   : > { %580 = vmatprep.subr.bf16.mxu0 %v579_v42 }
  0x2c   : > { %582 = vmatpush3.bf16.msra.mxu0 %v581_v46 }
  0x2d   : > { %584 = vmatprep.subr.bf16.mxu0 %v583_v49 }
  0x30   : > { %586 = vmatpush3.bf16.msra.mxu0 %v585_v53 }
  0x31   : > { %588 = vmatprep.subr.bf16.mxu0 %v587_v56 }
  0x34   : > { %590 = vmatpush3.bf16.msra.mxu0 %v589_v60 }
  0x35   : > { %592 = vmatprep.subr.bf16.mxu0 %v591_v61 }
  0x38   : > { %594 = vmatpush3.bf16.msra.mxu0 %v593_v0 }
  0xee   : > { %v289_v1 = vpop.f32.mrb[0].mxu0 }
  0xef   : > { %v291_v2 = vpop.f32.mrb[1].mxu0 }
  0xf0   : > { %412 = vmatprep.mubr.f32.mxu0 %v291_v2 }
  0xf1   : > { %413 = vmatmul.mubr.f32.vlgmr.msra.gmra.mrb[8].mxu0 %v289_v1 }
  0xf2   : > { %v295_v3 = vpop.f32.mrb[2].mxu0 }
  0xf3   : > { %v297_v4 = vpop.f32.mrb[3].mxu0 }
  0xf4   : > { %417 = vmatprep.mubr.f32.mxu1 %v297_v4 }
  0xf5   : > { %418 = vmatmul.mubr.f32.vlgmr.msra.gmra.mrb[0].mxu1 %v295_v3 }
  0xf6   : > { %v301_v5 = vpop.f32.mrb[4].mxu0 }
  0xf7   : > { %v303_v6 = vpop.f32.mrb[5].mxu0 }
  0xf8   : > { %422 = vmatprep.mubr.f32.mxu1 %v303_v6 }
  0xf9   : > { %423 = vmatmul.mubr.f32.gmra.mrb[2].mxu1 %v301_v5 }
  0xfa   : > { %v307_v7 = vpop.f32.mrb[6].mxu0 }
  0xfb   : > { %v309_v8 = vpop.f32.mrb[7].mxu0 }
  0xfc   : > { %427 = vmatprep.mubr.f32.mxu1 %v309_v8 }
  0xfd   : > { %428 = vmatmul.mubr.f32.gmra.mrb[4].mxu1 %v307_v7 }
 0x1c4   : > { %v543_v9 = vpop.f32.mrb[8].mxu0 }
 0x1c5   : > { %v544_v11 = vpop.f32.mrb[9].mxu0 }
 0x1c6   : > { %v545_v12 = vadd.f32 %v544_v11, %v543_v9 }
 0x1c8   : > { %v415_v13 = vadd.f32 %v545_v12, %v344_v10  ;;  %v546_v14 = vpop.f32.mrb[0].mxu1 }
 0x1c9   : > { %v547_v16 = vpop.f32.mrb[1].mxu1 }
 0x1ca   : > { %434 = vst.msk [vmem:[%s197_s26] sm:$0xff] %vm433_vm1, %v415_v13  ;;  %v548_v17 = vadd.f32 %v547_v16, %v546_v14 }
 0x1cc   : > { %v420_v18 = vadd.f32 %v548_v17, %v345_v15  ;;  %v549_v19 = vpop.f32.mrb[2].mxu1 }
 0x1cd   : > { %v550_v21 = vpop.f32.mrb[3].mxu1 }
 0x1ce   : > { %435 = vst.msk [vmem:[%s197_s26 + $0x8] sm:$0xff] %vm433_vm1, %v420_v18  ;;  %v551_v22 = vadd.f32 %v550_v21, %v549_v19 }
 0x1d0   : > { %v425_v23 = vadd.f32 %v551_v22, %v346_v20  ;;  %v552_v24 = vpop.f32.mrb[4].mxu1 }
 0x1d1   : > { %v553_v26 = vpop.f32.mrb[5].mxu1 }
 0x1d2   : > { %436 = vst.msk [vmem:[%s197_s26 + $0x10] sm:$0xff] %vm433_vm1, %v425_v23  ;;  %v554_v27 = vadd.f32 %v553_v26, %v552_v24 }
 0x1d4   : > { %v430_v28 = vadd.f32 %v554_v27, %v347_v25 }
 0x1d6   : > { %438 = vst.msk [vmem:[%s197_s26 + $0x18] sm:$0xf] %vm437_vm2, %v430_v28 }
 0x1d7 PF: > { %s14_s15 = sadd.s32 1, %s626_s15  }
 0x1d8   : > { %p11_p4 = scmp.ge.s32.totalorder %s14_s15, 4  }
 0x1da   :  { %13 = sbr.rel (!%p11_p4) target bundleno = 1 (0x1), region = 66 }

</bundles_post_ra>
